<compile_context>
chip_gen: v6e
topology: v6e:2x2x1
jax: 0.10.0
libtpu: 0.0.40
codegen_flags: <defaults>
</compile_context>

<pallas_src>
import functools

import jax
import jax.numpy as jnp
from jax import lax
from jax.experimental import pallas as pl
from jax.experimental.pallas import tpu as pltpu


HIDDEN = 128  # hidden width of both branches (fixed by the PyTorch module)


def _actor_critic_kernel(x_ref, w1_ref, b1_ref, w2_ref, b2_ref, out_ref, *,
                         action_dim):
    """One batch tile of the fused actor+critic MLP with packed weights.

    x_ref  : (TB, state_dim)         f32 (cast to MXU dtype in-kernel)
    w1_ref : (state_dim, 2*HIDDEN)   compute dtype   [w1_actor | w1_critic]
    b1_ref : (1, 2*HIDDEN)           f32             [b1_actor | b1_critic]
    w2_ref : (2*HIDDEN, OUT_LANES)   compute dtype   block-diagonal packing
    b2_ref : (1, OUT_LANES)          f32
    out_ref: (TB, OUT_LANES)         f32  (probs in lanes [0, action_dim),
                                           value in lane action_dim, zeros after)
    """
    # In-kernel cast of the state tile to the MXU compute dtype (VPU op hidden
    # under the matmul; replaces a separate wrapper-side XLA cast pass).
    x = x_ref[...].astype(w1_ref.dtype)

    # Fused first layer: both branches in one MXU pass (N = 256).
    h = jnp.dot(x, w1_ref[...], preferred_element_type=jnp.float32) + b1_ref[...]
    h = jnp.maximum(h, 0.0)                       # f32 elementwise (v5e-safe)

    # Fused second layer: block-diagonal weights -> lane-dense [TB, OUT_LANES].
    z = (jnp.dot(h.astype(w2_ref.dtype), w2_ref[...],
                 preferred_element_type=jnp.float32) + b2_ref[...])

    # Numerically stable softmax over the actor lanes only; padded lanes -> -inf.
    col = lax.broadcasted_iota(jnp.int32, z.shape, 1)
    is_actor = col < action_dim
    logits = jnp.where(is_actor, z, -jnp.inf)
    m = jnp.max(logits, axis=-1, keepdims=True)
    e = jnp.exp(logits - m)                       # exp(-inf) == 0 on padded lanes
    denom = jnp.sum(e, axis=-1, keepdims=True)
    probs = e * pl.reciprocal(denom, approx=False)  # exact: probs sum to 1

    # Lane-dense packed output: [actor probs | critic value | zeros].
    out_ref[...] = jnp.where(is_actor, probs, z).astype(out_ref.dtype)


def pack_params(params, action_dim, *, compute_dtype=jnp.bfloat16):
    """Pack + cast ONCE at init: 4 Linear layers -> 2 weight slabs + 2 bias rows.

    Call this outside the per-step path and reuse the returned slabs; nothing
    here is re-executed per forward call.
    """
    out_lanes = 128 * pl.cdiv(action_dim + 1, 128)          # lane-dense width
    w1 = jnp.concatenate([params["w1a"], params["w1c"]], axis=1)        # [S, 256]
    b1 = jnp.concatenate([params["b1a"], params["b1c"]], axis=1)        # [1, 256]
    w2 = jnp.zeros((2 * HIDDEN, out_lanes), jnp.float32)
    w2 = w2.at[:HIDDEN, :action_dim].set(params["w2a"])                 # actor block
    w2 = w2.at[HIDDEN:, action_dim:action_dim + 1].set(params["w2c"])   # critic block
    b2 = jnp.zeros((1, out_lanes), jnp.float32)
    b2 = b2.at[:, :action_dim].set(params["b2a"])
    b2 = b2.at[:, action_dim:action_dim + 1].set(params["b2c"])
    return dict(w1=jax.device_put(w1.astype(compute_dtype)),
                b1=jax.device_put(b1),
                w2=jax.device_put(w2.astype(compute_dtype)),
                b2=jax.device_put(b2))


@functools.partial(jax.jit,
                   static_argnames=("action_dim", "block_b", "min_grid_steps"))
def actor_critic_forward(state, w1, b1, w2, b2, *, action_dim,
                         block_b=2048, min_grid_steps=2):
    """state: [B, state_dim] f32.  Returns (probs [B, action_dim], value [B, 1]) f32.

    block_b        : target batch-tile (multiple of 8); large to amortize the
                     ~0.35 µs per-grid-step overhead (HBM/overhead-bound kernel).
    min_grid_steps : keep >= this many grid steps so "parallel" can use both
                     TensorCores on v7x (harmless on v5e/v6e).
    """
    B, state_dim = state.shape
    out_lanes = w2.shape[1]

    # Batch tile: multiple of 8 sublanes, capped so the grid has at least
    # min_grid_steps steps (when B allows it).
    tb_cap = 8 * pl.cdiv(B, 8 * min_grid_steps)
    tb = max(8, min(8 * max(1, block_b // 8), tb_cap))
    b_pad = tb * pl.cdiv(B, tb)
    n_steps = b_pad // tb

    x = state
    if b_pad != B:
        x = jnp.pad(x, ((0, b_pad - B), (0, 0)))

    cost = pl.CostEstimate(
        flops=2 * b_pad * (state_dim * 2 * HIDDEN + 2 * HIDDEN * out_lanes),
        transcendentals=b_pad * out_lanes,
        bytes_accessed=(b_pad * state_dim * x.dtype.itemsize
                        + w1.size * w1.dtype.itemsize
                        + b1.size * b1.dtype.itemsize
                        + w2.size * w2.dtype.itemsize
                        + b2.size * b2.dtype.itemsize
                        + b_pad * out_lanes * 4),
    )

    out = pl.pallas_call(
        functools.partial(_actor_critic_kernel, action_dim=action_dim),
        out_shape=jax.ShapeDtypeStruct((b_pad, out_lanes), jnp.float32),
        grid=(n_steps,),
        in_specs=[
            pl.BlockSpec((tb, state_dim), lambda i: (i, 0)),           # batch tile
            pl.BlockSpec((state_dim, 2 * HIDDEN), lambda i: (0, 0)),   # resident weights
            pl.BlockSpec((1, 2 * HIDDEN), lambda i: (0, 0)),
            pl.BlockSpec((2 * HIDDEN, out_lanes), lambda i: (0, 0)),
            pl.BlockSpec((1, out_lanes), lambda i: (0, 0)),
        ],
        out_specs=pl.BlockSpec((tb, out_lanes), lambda i: (i, 0)),
        compiler_params=pltpu.CompilerParams(
            dimension_semantics=("parallel",)),                        # 2 TCs on v7x
        cost_estimate=cost,
    )(x, w1, b1, w2, b2)

    # Inside this jit, the slices fuse with the kernel's consumer; no extra
    # wrapper-side pass over the packed slab.
    probs = out[:B, :action_dim]
    value = out[:B, action_dim:action_dim + 1]
    return probs, value


def init_params(key, state_dim, action_dim, hidden=HIDDEN):
    """Deterministic synthetic init (uniform, PyTorch-Linear-like scale)."""
    ks = jax.random.split(key, 8)

    def lin(kw, kb, fan_in, fan_out):
        bound = 1.0 / jnp.sqrt(fan_in)
        w = jax.random.uniform(kw, (fan_in, fan_out), jnp.float32, -bound, bound)
        b = jax.random.uniform(kb, (1, fan_out), jnp.float32, -bound, bound)
        return w, b

    w1a, b1a = lin(ks[0], ks[1], state_dim, hidden)
    w2a, b2a = lin(ks[2], ks[3], hidden, action_dim)
    w1c, b1c = lin(ks[4], ks[5], state_dim, hidden)
    w2c, b2c = lin(ks[6], ks[7], hidden, 1)
    return dict(w1a=w1a, b1a=b1a, w2a=w2a, b2a=b2a,
                w1c=w1c, b1c=b1c, w2c=w2c, b2c=b2c)


def reference_forward(state, p):
    h_a = jnp.maximum(state @ p["w1a"] + p["b1a"], 0.0)
    probs = jax.nn.softmax(h_a @ p["w2a"] + p["b2a"], axis=-1)
    h_c = jnp.maximum(state @ p["w1c"] + p["b1c"], 0.0)
    value = h_c @ p["w2c"] + p["b2c"]
    return probs, value


if __name__ == "__main__":
    key = jax.random.PRNGKey(0)
    k_state, k_state2, k_params = jax.random.split(key, 3)

    B, STATE_DIM, ACTION_DIM = 8, 16, 4
    state = jax.random.normal(k_state, (B, STATE_DIM), jnp.float32)
    params = init_params(k_params, STATE_DIM, ACTION_DIM)
    ref_probs, ref_value = reference_forward(state, params)

    # --- f32 matmul-input path (tight correctness check, single grid step) ---
    packed_f32 = pack_params(params, ACTION_DIM, compute_dtype=jnp.float32)
    probs, value = actor_critic_forward(
        state, packed_f32["w1"], packed_f32["b1"], packed_f32["w2"],
        packed_f32["b2"], action_dim=ACTION_DIM)
    jax.block_until_ready((probs, value))
    assert probs.shape == (B, ACTION_DIM) and value.shape == (B, 1)
    assert jnp.allclose(probs, ref_probs, atol=1e-3, rtol=1e-3)
    assert jnp.allclose(value, ref_value, atol=1e-3, rtol=1e-3)
    assert jnp.allclose(jnp.sum(probs, axis=-1), 1.0, atol=1e-3)

    # --- bf16 MXU-input fast path: multi-step grid + batch padding exercised ---
    packed_bf16 = pack_params(params, ACTION_DIM)           # packed/cast once
    B2 = 300
    state2 = jax.random.normal(k_state2, (B2, STATE_DIM), jnp.float32)
    ref_probs2, ref_value2 = reference_forward(state2, params)
    probs2, value2 = actor_critic_forward(
        state2, packed_bf16["w1"], packed_bf16["b1"], packed_bf16["w2"],
        packed_bf16["b2"], action_dim=ACTION_DIM, block_b=128)  # several steps
    jax.block_until_ready((probs2, value2))
    assert probs2.shape == (B2, ACTION_DIM) and value2.shape == (B2, 1)
    assert jnp.allclose(probs2, ref_probs2, atol=5e-2, rtol=5e-2)
    assert jnp.allclose(value2, ref_value2, atol=7e-2, rtol=7e-2)
    assert jnp.allclose(jnp.sum(probs2, axis=-1), 1.0, atol=2e-2)

    print("KERNEL_OK")
</pallas_src>

<mosaic_0001>
module attributes {stable_mosaic.version = 11 : i64} {
  func.func @_actor_critic_kernel(%arg0: i32, %arg1: memref<8x16xf32, #tpu.memory_space<vmem>>, %arg2: memref<16x256xf32, #tpu.memory_space<vmem>>, %arg3: memref<1x256xf32, #tpu.memory_space<vmem>>, %arg4: memref<256x128xf32, #tpu.memory_space<vmem>>, %arg5: memref<1x128xf32, #tpu.memory_space<vmem>>, %arg6: memref<8x128xf32, #tpu.memory_space<vmem>>) attributes {dimension_semantics = [#tpu.dimension_semantics<parallel>], iteration_bounds = array<i64: 1>, scalar_prefetch = 0 : i64, scratch_operands = 0 : i64, tpu.core_type = #tpu.core_type<tc>, window_params = [{transform_indices = @transform_0, window_bounds = array<i64: 8, 16>}, {pipeline_mode = #tpu.pipeline_mode<synchronous>, transform_indices = @transform_1, window_bounds = array<i64: 16, 256>}, {pipeline_mode = #tpu.pipeline_mode<synchronous>, transform_indices = @transform_2, window_bounds = array<i64: 1, 256>}, {pipeline_mode = #tpu.pipeline_mode<synchronous>, transform_indices = @transform_3, window_bounds = array<i64: 256, 128>}, {pipeline_mode = #tpu.pipeline_mode<synchronous>, transform_indices = @transform_4, window_bounds = array<i64: 1, 128>}, {transform_indices = @transform_5, window_bounds = array<i64: 8, 128>}]} {
    %c0 = arith.constant 0 : index
    %c0_0 = arith.constant 0 : index
    %0 = vector.load %arg1[%c0, %c0_0] : memref<8x16xf32, #tpu.memory_space<vmem>>, vector<8x16xf32>
    %c0_1 = arith.constant 0 : index
    %c0_2 = arith.constant 0 : index
    %1 = vector.load %arg2[%c0_1, %c0_2] : memref<16x256xf32, #tpu.memory_space<vmem>>, vector<16x256xf32>
    %cst = arith.constant dense<0.000000e+00> : vector<8x256xf32>
    %2 = tpu.matmul %0, %1, %cst {dimension_numbers = #tpu.dot_dimension_numbers<[1], [0], [0], [1], [0, 0, 1, 1], [], []>} : vector<8x16xf32>, vector<16x256xf32>, vector<8x256xf32> -> vector<8x256xf32>
    %c0_3 = arith.constant 0 : index
    %c0_4 = arith.constant 0 : index
    %3 = vector.load %arg3[%c0_3, %c0_4] : memref<1x256xf32, #tpu.memory_space<vmem>>, vector<1x256xf32>
    %4 = vector.broadcast %3 : vector<1x256xf32> to vector<8x256xf32>
    %5 = arith.addf %2, %4 : vector<8x256xf32>
    %cst_5 = arith.constant 0.000000e+00 : f32
    %6 = vector.broadcast %cst_5 : f32 to vector<8x256xf32>
    %7 = arith.maximumf %5, %6 : vector<8x256xf32>
    %c0_6 = arith.constant 0 : index
    %c0_7 = arith.constant 0 : index
    %8 = vector.load %arg4[%c0_6, %c0_7] : memref<256x128xf32, #tpu.memory_space<vmem>>, vector<256x128xf32>
    %cst_8 = arith.constant dense<0.000000e+00> : vector<8x128xf32>
    %9 = tpu.matmul %7, %8, %cst_8 {dimension_numbers = #tpu.dot_dimension_numbers<[1], [0], [0], [1], [0, 0, 1, 1], [], []>} : vector<8x256xf32>, vector<256x128xf32>, vector<8x128xf32> -> vector<8x128xf32>
    %c0_9 = arith.constant 0 : index
    %c0_10 = arith.constant 0 : index
    %10 = vector.load %arg5[%c0_9, %c0_10] : memref<1x128xf32, #tpu.memory_space<vmem>>, vector<1x128xf32>
    %11 = vector.broadcast %10 : vector<1x128xf32> to vector<8x128xf32>
    %12 = arith.addf %9, %11 : vector<8x128xf32>
    %13 = tpu.iota {dimensions = array<i32: 1>} : vector<8x128xi32>
    %c4_i32 = arith.constant 4 : i32
    %14 = vector.broadcast %c4_i32 : i32 to vector<8x128xi32>
    %15 = arith.cmpi slt, %13, %14 : vector<8x128xi32>
    %cst_11 = arith.constant 0xFF800000 : f32
    %16 = vector.broadcast %cst_11 : f32 to vector<8x128xf32>
    %17 = arith.select %15, %12, %16 : vector<8x128xi1>, vector<8x128xf32>
    %cst_12 = arith.constant dense<0xFF800000> : vector<8xf32>
    %18 = vector.multi_reduction <maximumf>, %17, %cst_12 [1] : vector<8x128xf32> to vector<8xf32>
    %19 = vector.shape_cast %18 : vector<8xf32> to vector<8x1xf32>
    %20 = vector.broadcast %19 : vector<8x1xf32> to vector<8x128xf32>
    %21 = arith.subf %17, %20 : vector<8x128xf32>
    %22 = math.exp %21 : vector<8x128xf32>
    %cst_13 = arith.constant dense<0.000000e+00> : vector<8xf32>
    %23 = vector.multi_reduction <add>, %22, %cst_13 [1] : vector<8x128xf32> to vector<8xf32>
    %24 = vector.shape_cast %23 : vector<8xf32> to vector<8x1xf32>
    %25 = tpu.reciprocal %24 : vector<8x1xf32> -> vector<8x1xf32>
    %26 = vector.broadcast %25 : vector<8x1xf32> to vector<8x128xf32>
    %27 = arith.mulf %22, %26 : vector<8x128xf32>
    %28 = arith.select %15, %27, %12 : vector<8x128xi1>, vector<8x128xf32>
    %c0_14 = arith.constant 0 : index
    %c0_15 = arith.constant 0 : index
    %29 = vector.load %arg6[%c0_14, %c0_15] : memref<8x128xf32, #tpu.memory_space<vmem>>, vector<8x128xf32>
    tpu.vector_store %arg6[%c0_14, %c0_15], %28 {strides = array<i32>} : memref<8x128xf32, #tpu.memory_space<vmem>>, vector<8x128xf32>,
    return
  }
  func.func @transform_0(%arg0: i32) -> (i32, i32) {
    %c0_i32 = arith.constant 0 : i32
    %c0_i32_0 = arith.constant 0 : i32
    return %arg0, %c0_i32 : i32, i32
  }
  func.func @transform_1(%arg0: i32) -> (i32, i32) {
    %c0_i32 = arith.constant 0 : i32
    %c0_i32_0 = arith.constant 0 : i32
    %c0_i32_1 = arith.constant 0 : i32
    return %c0_i32, %c0_i32_0 : i32, i32
  }
  func.func @transform_2(%arg0: i32) -> (i32, i32) {
    %c0_i32 = arith.constant 0 : i32
    %c0_i32_0 = arith.constant 0 : i32
    %c0_i32_1 = arith.constant 0 : i32
    return %c0_i32, %c0_i32_0 : i32, i32
  }
  func.func @transform_3(%arg0: i32) -> (i32, i32) {
    %c0_i32 = arith.constant 0 : i32
    %c0_i32_0 = arith.constant 0 : i32
    %c0_i32_1 = arith.constant 0 : i32
    return %c0_i32, %c0_i32_0 : i32, i32
  }
  func.func @transform_4(%arg0: i32) -> (i32, i32) {
    %c0_i32 = arith.constant 0 : i32
    %c0_i32_0 = arith.constant 0 : i32
    %c0_i32_1 = arith.constant 0 : i32
    return %c0_i32, %c0_i32_0 : i32, i32
  }
  func.func @transform_5(%arg0: i32) -> (i32, i32) {
    %c0_i32 = arith.constant 0 : i32
    %c0_i32_0 = arith.constant 0 : i32
    return %arg0, %c0_i32 : i32, i32
  }
}

</mosaic_0001>

<bundles_post_ra>
// kernel: actor_critic_forward.1
= control target key start
LH: loop header
LB: loop body
LE: loop exit
PB: predicated region body
PF: predicated region fallthrough
CT: control target
= control target key end

     0   :  { %10 = vsyncpa [#allocation3], 0  ;;  %s452_s0 = inlined_call_operand.hbm [shape: f32[8,16], index: 0, kind: input, shape index: {}]   ;;  %s453_s1 = inlined_call_operand.hbm [shape: f32[16,256], index: 1, kind: input, shape index: {}]   ;;  %s454_s2 = inlined_call_operand.vmem [shape: f32[1,256], index: 2, kind: input, shape index: {}]   ;;  %s455_s3 = inlined_call_operand.hbm [shape: f32[256,128], index: 3, kind: input, shape index: {}]   ;;  %s456_s4 = inlined_call_operand.vmem [shape: f32[1,128], index: 4, kind: input, shape index: {}]   ;;  %s457_s5 = inlined_call_operand.vmem [shape: f32[8,128], index: 5, kind: output, shape index: {}]  }
   0x1   :  { %11 = vsyncpa [#allocation5], 0  ;;  %s396_s18 = smov [#allocation4]  }
   0x2   :  { %s27_s19 = sshll.u32 %s396_s18, 4  ;;  %s28_s19 = int_to_ptr.vmem [resolvable:$true] %s27_s19 }
   0x3   :  { %s340_s20 = scalar_lea.vmem %s28_s19, 512  ;;  %p345_p1 = scmp.lt.s32.totalorder %s28_s19, %s28_s19 }
   0x4   :  { %p341_p0 = scmp.ne.s32.totalorder %s28_s19, %s340_s20  ;;  %p346_p2 = scmp.lt.s32.totalorder %s340_s20, %s340_s20 }
   0x6   :  { %p347_p3 = por %p346_p2, %p345_p1 }
   0x8   :  { %p348_p4 = pnand %p347_p3, %p341_p0 }
   0xa   :  { %351 = shalt.err (!%p348_p4)
}
   0xb   :  { %s397_s21 = smov 256   ;;  %s398_s22 = smov 16  }
   0xc   :  { %33 = dma.hbm_to_vmem [thread:$0]  %s453_s1, 512, %s28_s19, [#allocation5], %s397_s21, %s397_s21, %s398_s22  }
   0xd   :  { %s399_s25 = smov [#allocation2]   ;;  %s400_s27 = smov [#allocation6]  }
   0xe   :  { %s18_s26 = sshll.u32 %s399_s25, 4  ;;  %s41_s28 = sshll.u32 %s400_s27, 4  ;;  %s19_s26 = int_to_ptr.vmem [resolvable:$true] %s18_s26  ;;  %s42_s28 = int_to_ptr.vmem [resolvable:$true] %s41_s28 }
   0xf   :  { %s360_s29 = scalar_lea.vmem %s19_s26, 128  ;;  %p365_p6 = scmp.lt.s32.totalorder %s19_s26, %s19_s26 }
  0x10   :  { %p361_p5 = scmp.ne.s32.totalorder %s19_s26, %s360_s29  ;;  %p366_p7 = scmp.lt.s32.totalorder %s360_s29, %s360_s29 }
  0x12   :  { %p367_p8 = por %p366_p7, %p365_p6 }
  0x14   :  { %p368_p9 = pnand %p367_p8, %p361_p5 }
  0x16   :  { %371 = shalt.err (!%p368_p9)
}
  0x17   :  { %21 = dma.hbm_to_vmem [thread:$0]  %s452_s0, 128, %s19_s26, [#allocation3]  }
  0x18   :  { %s380_s7 = scalar_lea.vmem %s42_s28, 4096  ;;  %p385_p11 = scmp.lt.s32.totalorder %s42_s28, %s42_s28 }
  0x19   :  { %p381_p10 = scmp.ne.s32.totalorder %s42_s28, %s380_s7  ;;  %p386_p12 = scmp.lt.s32.totalorder %s380_s7, %s380_s7 }
  0x1b   :  { %p387_p13 = por %p386_p12, %p385_p11 }
  0x1d   :  { %p388_p0 = pnand %p387_p13, %p381_p10 }
  0x1f   :  { %391 = shalt.err (!%p388_p0)
}
  0x20   :  { %s401_s1 = smov 128   ;;  %s402_s8 = smov 8  }
  0x21   :  { %47 = dma.hbm_to_vmem [thread:$0]  %s455_s3, 4096, %s42_s28, [#allocation5], %s401_s1, %s401_s1, %s402_s8  }
  0x22   :  { %392 = dma.done.wait [#allocation3], 128  }
  0x23   :  { %393 = vsyncadd [#allocation3], 4294967168 }
  0x24   :  { %394 = dma.done.wait [#allocation5], 4608  }
  0x25   :  { %395 = vsyncadd [#allocation5], 4294962688  ;;  %v403_v0 = vmov 0.0   ;;  %v63_v1 = vld [vmem:[#allocation4 + $0x18] sm:$0xff]  ;;  %v62_v2 = vld [vmem:[#allocation4 + $0x10] sm:$0xff]  ;;  %vm76_vm0 = vcmask 130048   ;;  %v66_v38 = vlaneseq }
  0x26   :  { %144 = vmatprep.mubr.f32.mxu0 %v403_v0  ;;  %v61_v3 = vld [vmem:[#allocation4 + $0x8] sm:$0xff]  ;;  %108 = vmatprep.subr.mxu0 %v63_v1  ;;  %v60_v4 = vld [vmem:[#allocation4] sm:$0xff]  ;;  %v59_v5 = vld [vmem:[#allocation2] sm:$0xff] }
  0x27   :  { %v184_v6 = vld [vmem:[#allocation6 + $0xf8] sm:$0xff]  ;;  %109 = vmatpush1.msra.mxu0 %v62_v2  ;;  %v183_v8 = vld [vmem:[#allocation6 + $0xf0] sm:$0xff]  ;;  %v182_v10 = vld [vmem:[#allocation6 + $0xe8] sm:$0xff]  ;;  %v67_v39 = vshrl.u32 %v66_v38, 7  ;;  %v263_v52 = vand.u32 127, %v66_v38 }
  0x28   :  { %285 = vmatprep.subr.mxu1 %v184_v6  ;;  %v168_v7 = vld [vmem:[#allocation6 + $0x78] sm:$0xff]  ;;  %v167_v9 = vld [vmem:[#allocation6 + $0x70] sm:$0xff]  ;;  %110 = vmatprep.subr.mxu0 %v61_v3  ;;  %v166_v11 = vld [vmem:[#allocation6 + $0x68] sm:$0xff] }
  0x29   :  { %286 = vmatpush3.msra.mxu1 %v168_v7  ;;  %111 = vmatpush1.msra.mxu0 %v60_v4  ;;  %v181_v12 = vld [vmem:[#allocation6 + $0xe0] sm:$0xff]  ;;  %v180_v14 = vld [vmem:[#allocation6 + $0xd8] sm:$0xff]  ;;  %v179_v16 = vld [vmem:[#allocation6 + $0xd0] sm:$0xff]  ;;  %v68_v40 = vsub.s32 0, %v67_v39  ;;  %v72_v42 = vsub.s32 1, %v67_v39  ;;  %vm264_vm1 = vcmp.lt.s32.totalorder %v263_v52, 4 }
  0x2a   :  { %287 = vmatprep.subr.mxu1 %v183_v8  ;;  %283 = vmatmul.mubr.msk.f32.vlgmr.msra.gmra.mxu0 %vm76_vm0, %v59_v5  ;;  %v165_v13 = vld [vmem:[#allocation6 + $0x60] sm:$0xff]  ;;  %v164_v15 = vld [vmem:[#allocation6 + $0x58] sm:$0xff]  ;;  %v163_v17 = vld [vmem:[#allocation6 + $0x50] sm:$0xff] }
  0x2b   :  { %288 = vmatpush3.msra.mxu1 %v167_v9  ;;  %v178_v18 = vld [vmem:[#allocation6 + $0xc8] sm:$0xff]  ;;  %v177_v20 = vld [vmem:[#allocation6 + $0xc0] sm:$0xff]  ;;  %v176_v22 = vld [vmem:[#allocation6 + $0xb8] sm:$0xff] }
  0x2c   :  { %289 = vmatprep.subr.mxu1 %v182_v10  ;;  %v162_v19 = vld [vmem:[#allocation6 + $0x48] sm:$0xff]  ;;  %v161_v21 = vld [vmem:[#allocation6 + $0x40] sm:$0xff]  ;;  %v160_v23 = vld [vmem:[#allocation6 + $0x38] sm:$0xff] }
  0x2d   :  { %290 = vmatpush3.msra.mxu1 %v166_v11  ;;  %v175_v24 = vld [vmem:[#allocation6 + $0xb0] sm:$0xff]  ;;  %v174_v26 = vld [vmem:[#allocation6 + $0xa8] sm:$0xff]  ;;  %v173_v28 = vld [vmem:[#allocation6 + $0xa0] sm:$0xff] }
  0x2e   :  { %291 = vmatprep.subr.mxu1 %v181_v12  ;;  %v159_v25 = vld [vmem:[#allocation6 + $0x30] sm:$0xff]  ;;  %v158_v27 = vld [vmem:[#allocation6 + $0x28] sm:$0xff]  ;;  %v157_v29 = vld [vmem:[#allocation6 + $0x20] sm:$0xff] }
  0x2f   :  { %292 = vmatpush3.msra.mxu1 %v165_v13  ;;  %v172_v30 = vld [vmem:[#allocation6 + $0x98] sm:$0xff]  ;;  %v171_v32 = vld [vmem:[#allocation6 + $0x90] sm:$0xff]  ;;  %v170_v34 = vld [vmem:[#allocation6 + $0x88] sm:$0xff] }
  0x30   :  { %293 = vmatprep.subr.mxu1 %v180_v14  ;;  %v156_v31 = vld [vmem:[#allocation6 + $0x18] sm:$0xff]  ;;  %v155_v33 = vld [vmem:[#allocation6 + $0x10] sm:$0xff]  ;;  %v154_v35 = vld [vmem:[#allocation6 + $0x8] sm:$0xff] }
  0x31   :  { %294 = vmatpush3.msra.mxu1 %v164_v15  ;;  %v169_v36 = vld [vmem:[#allocation6 + $0x80] sm:$0xff]  ;;  %v64_v41 = vld [vmem:[%s454_s2] sm:$0x3] }
  0x32   :  { %295 = vmatprep.subr.mxu1 %v179_v16  ;;  %v153_v37 = vld [vmem:[#allocation6] sm:$0xff]  ;;  %v69_v43 = vrot.slane %v64_v41, %v68_v40  ;;  %v73_v44 = vrot.slane %v64_v41, %v72_v42  ;;  %v284_v54 = vld [vmem:[%s456_s4] ss:$0 sm:$0xff] }
  0x33   :  { %296 = vmatpush3.msra.mxu1 %v163_v17 }
  0x34   :  { %297 = vmatprep.subr.mxu1 %v178_v18 }
  0x35   :  { %298 = vmatpush3.msra.mxu1 %v162_v19 }
  0x36   :  { %299 = vmatprep.subr.mxu1 %v177_v20 }
  0x37   :  { %300 = vmatpush3.msra.mxu1 %v161_v21 }
  0x38   :  { %301 = vmatprep.subr.mxu1 %v176_v22 }
  0x39   :  { %302 = vmatpush3.msra.mxu1 %v160_v23 }
  0x3a   :  { %303 = vmatprep.subr.mxu1 %v175_v24 }
  0x3b   :  { %304 = vmatpush3.msra.mxu1 %v159_v25 }
  0x3c   :  { %305 = vmatprep.subr.mxu1 %v174_v26 }
  0x3d   :  { %306 = vmatpush3.msra.mxu1 %v158_v27 }
  0x3e   :  { %307 = vmatprep.subr.mxu1 %v173_v28 }
  0x3f   :  { %308 = vmatpush3.msra.mxu1 %v157_v29 }
  0x40   :  { %309 = vmatprep.subr.mxu1 %v172_v30 }
  0x41   :  { %310 = vmatpush3.msra.mxu1 %v156_v31 }
  0x42   :  { %311 = vmatprep.subr.mxu1 %v171_v32 }
  0x43   :  { %312 = vmatpush3.msra.mxu1 %v155_v33 }
  0x44   :  { %313 = vmatprep.subr.mxu1 %v170_v34 }
  0x45   :  { %314 = vmatpush3.msra.mxu1 %v154_v35 }
  0x46   :  { %315 = vmatprep.subr.mxu1 %v169_v36 }
  0x47   :  { %316 = vmatpush3.msra.mxu1 %v153_v37 }
  0xea   :  { %v146_v45 = vpop.f32.mrf.mxu0 }
  0xeb   :  { %v147_v46 = vadd.f32 %v146_v45, %v69_v43 }
  0xec   :  { %v148_v47 = vpop.f32.mrf.mxu0 }
  0xed   :  { %v149_v48 = vadd.f32 %v148_v47, %v73_v44  ;;  %v151_v50 = vmax.f32 %v147_v46, 0.0 }
  0xef   :  { %v152_v49 = vmax.f32 %v149_v48, 0.0 }
  0xf1   :  { %256 = vmatprep.mubr.f32.mxu1 %v152_v49 }
  0xf2   :  { %257 = vmatmul.mubr.f32.vlgmr.msra.gmra.mxu1 %v151_v50 }
 0x1b2   :  { %v317_v51 = vpop.f32.mrf.mxu1 }
 0x1b4   :  { %v318_v53 = vpop.f32.mrf.mxu1 }
 0x1b5   :  { %v319_v55 = vadd.f32 %v318_v53, %v317_v51 }
 0x1b7   :  { %v259_v56 = vadd.f32 %v319_v55, %v284_v54 }
 0x1b9   :  { %v265_v57 = vsel %vm264_vm1, %v259_v56, -inf }
 0x1ba   :  { %266 = vmax.xlane.f32.xlu0 %v265_v57 }
 0x243   :  { %v267_v58 = vpop.xlane.xlu0 %266 }
 0x244   :  { %v268_v59 = vsub.f32 %v265_v57, %v267_v58 }
 0x246   :  { %v269_v60 = vmul.f32 1.442695, %v268_v59 }
 0x248   :  { %328 = vpow2.f32 %v269_v60 }
 0x255   :  { %v329_v61 = vpop.eup %328 }
 0x256   :  { %271 = vadd.xlane.f32.xlu0 %v329_v61 }
 0x2df   :  { %v272_v62 = vpop.xlane.xlu0 %271 }
 0x2e0   :  { %330 = vrcp.f32 %v272_v62 }
 0x2ed   :  { %v331_v63 = vpop.eup %330 }
 0x2ee   :  { %v274_v0 = vmul.f32 %v331_v63, %v329_v61 }
 0x2f0   :  { %v275_v1 = vsel %vm264_vm1, %v274_v0, %v259_v56 }
 0x2f1   :  { %276 = vst [vmem:[%s457_s5] sm:$0xff] %v275_v1 }
 0x2f2   :  { %281 = vsyncpa [#allocation3], 1 }
 0x2f3   :  { %282 = vsyncpa [#allocation5], 1 }

</bundles_post_ra>
